<compile_context>
chip_gen: v7x
topology: tpu7x:2x2x1
jax: 0.10.0
libtpu: 0.0.40
codegen_flags: <defaults>
</compile_context>

<pallas_src>
import functools
from math import sqrt

import jax
import jax.numpy as jnp
from jax.experimental import pallas as pl
from jax.experimental.pallas import tpu as pltpu


_TARGET_BLOCK_BYTES = 4 * 1024 * 1024   # per-block VMEM target (1-4 MiB sweet spot)
_MIN_VMEM_LIMIT = 32 * 1024 * 1024      # raise above v5e's 16 MiB scoped default
_MAX_VMEM_LIMIT = 48 * 1024 * 1024      # stay comfortably within v7x's 64 MiB/TC


def _sublane_packing(dtype) -> int:
    # rows per packed sublane group: f32 -> 8, bf16 -> 16, int8/fp8 -> 32
    return max(8, 32 // jnp.dtype(dtype).itemsize)


def _round_up(x: int, m: int) -> int:
    return ((x + m - 1) // m) * m


def _vmem_limit(block_bytes: int) -> int:
    # 2x double-buffered input blocks + 2x output blocks + slack for weight/scalars.
    return int(min(max(4 * block_bytes + (4 << 20), _MIN_VMEM_LIMIT), _MAX_VMEM_LIMIT))


# ---------------------------------------------------------------------------
# Kernels
# ---------------------------------------------------------------------------

def _rmsnorm_lane_kernel(x_ref, w_ref, o_ref, *, eps):
    # x_ref: (tile_rows, D)  w_ref: (1, D)  — normalize over the lane (last) axis.
    x = x_ref[...].astype(jnp.float32)
    w = w_ref[...].astype(jnp.float32)           # broadcasts over rows
    ms = jnp.mean(x * x, axis=-1, keepdims=True)
    inv = jax.lax.rsqrt(ms + eps)                # EUP
    o_ref[...] = (w * x * inv).astype(o_ref.dtype)


def _rmsnorm_sublane_kernel(x_ref, w_ref, o_ref, *, eps):
    # x_ref: (1, C, tile_hw)  w_ref: (1, C, 1)  — normalize over the C (sublane) axis.
    x = x_ref[...].astype(jnp.float32)
    w = w_ref[...].astype(jnp.float32)
    ms = jnp.mean(x * x, axis=1, keepdims=True)  # cross-sublane reduce (XLU)
    inv = jax.lax.rsqrt(ms + eps)
    o_ref[...] = (w * x * inv).astype(o_ref.dtype)


# ---------------------------------------------------------------------------
# Wrappers
# ---------------------------------------------------------------------------

def _rmsnorm_rows(x2d: jax.Array, weight: jax.Array, eps: float) -> jax.Array:
    """RMS-norm over the last axis of a (rows, D) array."""
    R, D = x2d.shape
    itemsize = jnp.dtype(x2d.dtype).itemsize
    pack = _sublane_packing(x2d.dtype)

    # VMEM-budgeted row tile (block ~ _TARGET_BLOCK_BYTES), multiple of sublane packing.
    tile = max(pack, (_TARGET_BLOCK_BYTES // max(D * itemsize, 1)) // pack * pack)
    # Keep >= 2 grid steps when possible so v7x can shard rows across its 2 TCs.
    if R > pack:
        tile = min(tile, _round_up(pl.cdiv(R, 2), pack))
    if tile >= R:
        tile = R                                  # single full-extent block (always legal)
    grid = (pl.cdiv(R, tile),)                    # partial last block handled by masking
    block_bytes = tile * D * itemsize

    cost = pl.CostEstimate(
        flops=4 * R * D,
        transcendentals=R,
        bytes_accessed=2 * R * D * itemsize + D * itemsize,
    )

    # TODO(synk): if D is small / not a multiple of 128, lanes are only partially used
    # (masked stores); a lane-folding layout would recover store bandwidth.
    return pl.pallas_call(
        functools.partial(_rmsnorm_lane_kernel, eps=eps),
        out_shape=jax.ShapeDtypeStruct((R, D), x2d.dtype),
        grid_spec=pltpu.PrefetchScalarGridSpec(
            num_scalar_prefetch=0,
            grid=grid,
            in_specs=[
                pl.BlockSpec((tile, D), lambda i: (i, 0)),
                pl.BlockSpec((1, D), lambda i: (0, 0)),   # constant index -> stays resident
            ],
            out_specs=pl.BlockSpec((tile, D), lambda i: (i, 0)),
        ),
        compiler_params=pltpu.CompilerParams(
            dimension_semantics=("parallel",),
            vmem_limit_bytes=_vmem_limit(block_bytes)),
        cost_estimate=cost,
    )(x2d, weight.reshape(1, D))


def _rmsnorm_channels(x3d: jax.Array, weight: jax.Array, eps: float) -> jax.Array:
    """RMS-norm over the channel axis of a (N, C, H*W) array (no transposes)."""
    N, C, HW = x3d.shape
    itemsize = jnp.dtype(x3d.dtype).itemsize

    # Lane tile over the flattened spatial axis: multiple of 128, VMEM-budget sized.
    tile_hw = max(128, (_TARGET_BLOCK_BYTES // max(C * itemsize, 1)) // 128 * 128)
    if N == 1 and HW > 128:
        # keep >= 2 grid steps so v7x can still shard across its 2 TCs
        tile_hw = min(tile_hw, _round_up(pl.cdiv(HW, 2), 128))
    if tile_hw >= HW:
        tile_hw = HW                              # single full-extent block (always legal)
    grid = (N, pl.cdiv(HW, tile_hw))
    block_bytes = C * tile_hw * itemsize

    cost = pl.CostEstimate(
        flops=4 * N * C * HW,
        transcendentals=N * HW,
        bytes_accessed=2 * N * C * HW * itemsize + C * itemsize,
    )

    return pl.pallas_call(
        functools.partial(_rmsnorm_sublane_kernel, eps=eps),
        out_shape=jax.ShapeDtypeStruct((N, C, HW), x3d.dtype),
        grid_spec=pltpu.PrefetchScalarGridSpec(
            num_scalar_prefetch=0,
            grid=grid,
            in_specs=[
                pl.BlockSpec((1, C, tile_hw), lambda n, s: (n, 0, s)),
                pl.BlockSpec((1, C, 1), lambda n, s: (0, 0, 0)),
            ],
            out_specs=pl.BlockSpec((1, C, tile_hw), lambda n, s: (n, 0, s)),
        ),
        compiler_params=pltpu.CompilerParams(
            dimension_semantics=("parallel", "parallel"),
            vmem_limit_bytes=_vmem_limit(block_bytes)),
        cost_estimate=cost,
    )(x3d, weight)


def rmsnorm(x: jax.Array, weight: jax.Array, eps: float = 1e-6,
            conv: bool = False) -> jax.Array:
    if not conv:
        # weight: (d_model,), normalize over the last axis
        d = x.shape[-1]
        out = _rmsnorm_rows(x.reshape(-1, d), weight, eps)
        return out.reshape(x.shape)
    # weight: (1, C, 1, 1), x: NCHW, normalize over the channel axis (dim 1).
    # Merge trailing spatial dims (free reshape) — no transpose round trips.
    n, c, h, w = x.shape
    out = _rmsnorm_channels(x.reshape(n, c, h * w), weight.reshape(1, c, 1), eps)
    return out.reshape(n, c, h, w)


def _ref_rmsnorm(x, weight, eps, conv):
    # pure-JAX reference mirroring the PyTorch forward
    dim = 1 if conv else -1
    w = weight if not conv else weight.reshape(1, -1, 1, 1)
    return w * x * jax.lax.rsqrt(jnp.mean(x * x, axis=dim, keepdims=True) + eps)


if __name__ == "__main__":
    key = jax.random.PRNGKey(0)
    k_w1, k_x1, k_w2, k_x2 = jax.random.split(key, 4)

    # ---- conv=False: x (batch=2, seq=8, d_model=32) ----
    d_model = 32
    w_seq = 1.0 + sqrt(1.0 / d_model) * jax.random.normal(k_w1, (d_model,), jnp.float32)
    x_seq = jax.random.normal(k_x1, (2, 8, d_model), jnp.float32)
    y_seq = jax.block_until_ready(rmsnorm(x_seq, w_seq, eps=1e-6, conv=False))
    ref_seq = _ref_rmsnorm(x_seq, w_seq, 1e-6, conv=False)
    assert jnp.allclose(y_seq, ref_seq, atol=1e-5, rtol=1e-5)

    # ---- conv=True: x NCHW (2, 4, 16, 16), d_model = channels = 4 ----
    c = 4
    w_conv = 1.0 + sqrt(1.0 / c) * jax.random.normal(k_w2, (1, c, 1, 1), jnp.float32)
    x_conv = jax.random.normal(k_x2, (2, c, 16, 16), jnp.float32)
    y_conv = jax.block_until_ready(rmsnorm(x_conv, w_conv, eps=1e-6, conv=True))
    ref_conv = _ref_rmsnorm(x_conv, w_conv, 1e-6, conv=True)
    assert jnp.allclose(y_conv, ref_conv, atol=1e-5, rtol=1e-5)

    print("KERNEL_OK")
</pallas_src>

<mosaic_0001>
module attributes {stable_mosaic.version = 11 : i64} {
  func.func @_rmsnorm_lane_kernel(%arg0: i32, %arg1: memref<8x32xf32, #tpu.memory_space<vmem>>, %arg2: memref<1x32xf32, #tpu.memory_space<vmem>>, %arg3: memref<8x32xf32, #tpu.memory_space<vmem>>) attributes {dimension_semantics = [#tpu.dimension_semantics<parallel>], iteration_bounds = array<i64: 2>, scalar_prefetch = 0 : i64, scratch_operands = 0 : i64, tpu.core_type = #tpu.core_type<tc>, window_params = [{transform_indices = @transform_0, window_bounds = array<i64: 8, 32>}, {pipeline_mode = #tpu.pipeline_mode<synchronous>, transform_indices = @transform_1, window_bounds = array<i64: 1, 32>}, {transform_indices = @transform_2, window_bounds = array<i64: 8, 32>}]} {
    %c0 = arith.constant 0 : index
    %c0_0 = arith.constant 0 : index
    %0 = vector.load %arg1[%c0, %c0_0] : memref<8x32xf32, #tpu.memory_space<vmem>>, vector<8x32xf32>
    %c0_1 = arith.constant 0 : index
    %c0_2 = arith.constant 0 : index
    %1 = vector.load %arg2[%c0_1, %c0_2] : memref<1x32xf32, #tpu.memory_space<vmem>>, vector<1x32xf32>
    %2 = arith.mulf %0, %0 : vector<8x32xf32>
    %cst = arith.constant dense<0.000000e+00> : vector<8xf32>
    %3 = vector.multi_reduction <add>, %2, %cst [1] : vector<8x32xf32> to vector<8xf32>
    %4 = vector.shape_cast %3 : vector<8xf32> to vector<8x1xf32>
    %cst_3 = arith.constant 3.200000e+01 : f32
    %5 = vector.broadcast %cst_3 : f32 to vector<8x1xf32>
    %6 = arith.divf %4, %5 : vector<8x1xf32>
    %cst_4 = arith.constant 9.99999997E-7 : f32
    %7 = vector.broadcast %cst_4 : f32 to vector<8x1xf32>
    %8 = arith.addf %6, %7 : vector<8x1xf32>
    %9 = math.rsqrt %8 : vector<8x1xf32>
    %10 = vector.broadcast %1 : vector<1x32xf32> to vector<8x32xf32>
    %11 = arith.mulf %10, %0 : vector<8x32xf32>
    %12 = vector.broadcast %9 : vector<8x1xf32> to vector<8x32xf32>
    %13 = arith.mulf %11, %12 : vector<8x32xf32>
    %c0_5 = arith.constant 0 : index
    %c0_6 = arith.constant 0 : index
    %14 = vector.load %arg3[%c0_5, %c0_6] : memref<8x32xf32, #tpu.memory_space<vmem>>, vector<8x32xf32>
    tpu.vector_store %arg3[%c0_5, %c0_6], %13 {strides = array<i32>} : memref<8x32xf32, #tpu.memory_space<vmem>>, vector<8x32xf32>,
    return
  }
  func.func @transform_0(%arg0: i32) -> (i32, i32) {
    %c0_i32 = arith.constant 0 : i32
    %c0_i32_0 = arith.constant 0 : i32
    return %arg0, %c0_i32 : i32, i32
  }
  func.func @transform_1(%arg0: i32) -> (i32, i32) {
    %c0_i32 = arith.constant 0 : i32
    %c0_i32_0 = arith.constant 0 : i32
    %c0_i32_1 = arith.constant 0 : i32
    return %c0_i32, %c0_i32_0 : i32, i32
  }
  func.func @transform_2(%arg0: i32) -> (i32, i32) {
    %c0_i32 = arith.constant 0 : i32
    %c0_i32_0 = arith.constant 0 : i32
    return %arg0, %c0_i32 : i32, i32
  }
}

</mosaic_0001>

<bundles_post_ra>
// kernel: tpu_custom_call.1
= control target key start
LH: loop header
LB: loop body
LE: loop exit
PB: predicated region body
PF: predicated region fallthrough
CT: control target
= control target key end

     0   :  { %7 = vsyncpa [#allocation3], 0  ;;  %s605_s0 = inlined_call_operand.hbm [shape: f32[16,32], index: 0, kind: input, shape index: {}]   ;;  %s606_s1 = inlined_call_operand.vmem [shape: f32[1,32], index: 1, kind: input, shape index: {}]   ;;  %s607_s2 = inlined_call_operand.hbm [shape: f32[16,32], index: 2, kind: output, shape index: {}]  }
   0x1   :  { %9 = vsyncpa [#allocation3 + $0x1], 0 }
   0x2   :  { %10 = vsyncpa [#allocation4], 0 }
   0x3   :  { %12 = vsyncpa [#allocation4 + $0x1], 0  ;;  %s439_s9 = smov 0   ;;  %s441_s10 = smov 0  }
   0x4   :  { %s443_s11 = smov 0   ;;  %s445_s12 = smov 0  }
   0x5 LB: > { %s460_s13 = sadd.s32 4294967295, %s420_s12   ;;  %s263_s14 = sadd.s32 4294967294, %s420_s12   ;;  %s420_s12 = sphi %s445_s12, %s622_s12   ;;  %s416_s11 = sphi %s443_s11, %s621_s11   ;;  %s412_s10 = sphi %s441_s10, %s620_s10   ;;  %s408_s9 = sphi %s439_s9, %s619_s9  }
   0x6   : > { %s464_s15 = sadd.s32 1, %s420_s12   ;;  %s25_s16 = sadd.s32 1, %s416_s11 }
   0x7   : > { %s22_s17 = ssub.s32 %s420_s12, %s464_s15  ;;  %p32_p0 = scmp.ne.s32.totalorder %s416_s11, %s412_s10 }
   0x8   : > { %p23_p1 = scmp.eq.s32.totalorder %s22_s17, 0  ;;  %p33_p2 = scmp.eq.s32.totalorder %s420_s12, 0 }
   0x9   : > { %p38_p3 = scmp.ne.s32.totalorder %s412_s10, %s408_s9  ;;  %p39_p4 = scmp.eq.s32.totalorder %s460_s13, 0 }
   0xa   : > { %s476_s18 = scalar_select %p23_p1, %s416_s11, %s25_s16  }
   0xb   : > { %p478_p5 = por %p33_p2, %p32_p0  ;;  %p482_p6 = por %p39_p4, %p38_p3 }
   0xc   : > { %p83_p7 = scmp.eq.s32.totalorder %s460_s13, 1  ;;  %p89_p8 = scmp.eq.s32.totalorder %s263_s14, 1 }
   0xd   : > { %p288_p10 = scmp.lt.s32.totalorder %s420_s12, 2  ;;  %s112_s23 = sand.u32 1, %s416_s11  }
   0xe   : > { %p489_p11 = por %p83_p7, %p32_p0  ;;  %p493_p12 = por %p89_p8, %p38_p3 }
   0xf   : > { %s267_s24 = sshll.u32 %s420_s12, 7  ;;  %s266_s25 = sshll.u32 %s112_s23, 3 }
  0x10   : > { %s611_s21 = scalar_select %p489_p11, 1, 0 }
  0x11   : > { %s612_s22 = scalar_select %p493_p12, 1, 0 }
  0x12   : > { %s502_s28 = scalar_lea.hbm %s605_s0, %s267_s24  ;;  %s116_s29 = scalar_lea.vmem [#allocation2], %s266_s25 }
  0x13   : > { %s123_s30 = sshll.u32 %s116_s29, 4  ;;  %p506_p13 = pnand %p288_p10, %p478_p5  ;;  %s510_s30 = int_to_ptr.vmem [resolvable:$true] %s123_s30 }
  0x14   : > { %s113_s4 = scalar_lea.sflag [#allocation3], %s112_s23  ;;  %s324_s5 = scalar_lea.hbm %s502_s28, 128 }
  0x15   : > { %p325_p2 = scmp.ne.s32.totalorder %s502_s28, %s324_s5  ;;  %p326_p3 = pneg %p506_p13 }
  0x16   : > { %s329_s8 = scalar_lea.hbm %s605_s0, 256  ;;  %p330_p5 = scmp.lt.u32.totalorder %s502_s28, %s605_s0 }
  0x17   : > { %p327_p4 = pnand %p326_p3, %p325_p2  ;;  %p331_p8 = scmp.lt.u32.totalorder %s329_s8, %s324_s5 }
  0x18   : > { %p333_p9 = scmp.lt.u32.totalorder %s324_s5, %s502_s28 }
  0x19   : > { %p328_p7 = pneg %p327_p4  ;;  %p332_p10 = por %p331_p8, %p330_p5 }
  0x1b   : > { %p334_p0 = por %p333_p9, %p332_p10 }
  0x1d   : > { %p335_p1 = pnand %p334_p0, %p328_p7 }
  0x1f   : > { %338 = shalt.err (!%p335_p1)
}
  0x20   : > { %s339_s17 = scalar_lea.vmem %s510_s30, 128  ;;  %s422_s19 = smov [#allocation2]  }
  0x21   : > { %p340_p2 = scmp.ne.s32.totalorder %s510_s30, %s339_s17  ;;  %s344_s23 = sshll.u32 %s422_s19, 4  ;;  %s345_s23 = int_to_ptr.vmem [resolvable:$false] %s344_s23 }
  0x22   : > { %s346_s24 = scalar_lea.vmem %s345_s23, 256  ;;  %p347_p11 = scmp.lt.s32.totalorder %s510_s30, %s345_s23 }
  0x23   : > { %p342_p4 = pnand %p340_p2, %p326_p3  ;;  %p348_p5 = scmp.lt.s32.totalorder %s346_s24, %s339_s17 }
  0x25   : > { %p343_p12 = pneg %p342_p4  ;;  %p349_p8 = por %p348_p5, %p347_p11 }
  0x27   : > { %p350_p9 = pnand %p349_p8, %p343_p12 }
  0x29   : > { %353 = shalt.err (!%p350_p9)
}
  0x2a   : > { %283 = dma.hbm_to_vmem [thread:$0]  (!%p506_p13), %s502_s28, 128, %s510_s30, %s113_s4  }
  0x2b   : > { %p614_p0 = scmp.lt.s32.totalorder %s420_s12, 3  ;;  %p615_p1 = scmp.ge.s32.totalorder %s420_s12, 1 }
  0x2d   : > { %p129_p3 = pnand %p615_p1, %p614_p0 }
  0x2e   : > { %s544_s25 = sand.u32 (!%p129_p3), 1, %s412_s10  }
  0x2f   : > { %132 = sbr.rel (%p129_p3) target bundleno = 232 (0xe8), region = 28  ;;  %s269_s26 = sshll.u32 (!%p129_p3), %s544_s25, 3 }
  0x30   : > { %s135_s27 = scalar_lea.sflag (!%p129_p3), [#allocation3], %s544_s25  ;;  %s138_s29 = scalar_lea.vmem (!%p129_p3), [#allocation2], %s269_s26 }
  0x36   : > { %399 = dma.done.wait (%p482_p6), %s135_s27, 128  }
  0x37   : > { %401 = vsyncadd (%p482_p6), %s135_s27, 4294967168  ;;  %v159_v0 = vld [vmem:[%s138_s29] sm:$0xff]  ;;  %vm162_vm0 = vcmask 261120   ;;  %s273_s20 = sshll.u32 %s460_s13, 7  ;;  %s158_s3 = scalar_lea.vmem [#allocation5], %s269_s26 }
  0x38   : > { %v161_v1 = vmul.f32 %v159_v0, %v159_v0  ;;  %v271_v6 = vld [vmem:[%s606_s1] ss:$0 sm:$0xff]  ;;  %s193_s4 = sshll.u32 %s158_s3, 4  ;;  %s560_s7 = scalar_lea.hbm %s607_s2, %s273_s20  ;;  %s562_s4 = int_to_ptr.vmem [resolvable:$true] %s193_s4 }
  0x39   : > { %v176_v7 = vmul.f32 %v271_v6, %v159_v0  ;;  %s180_s8 = scalar_lea.sflag [#allocation4], %s544_s25  ;;  %s354_s14 = scalar_lea.vmem %s562_s4, 128 }
  0x3a   : > { %v163_v2 = vsel %vm162_vm0, %v161_v1, 0.0  ;;  %p355_p6 = scmp.ne.s32.totalorder %s562_s4, %s354_s14  ;;  %p616_p11 = scmp.ne.s32.totalorder %s611_s21, 0 }
  0x3b   : > { %164 = vadd.xlane.f32.xlu0 %v163_v2  ;;  %s423_s13 = smov [#allocation5]  }
  0x3c   : > { %p356_p12 = pnand %p355_p6, %p616_p11  ;;  %s358_s16 = sshll.u32 %s423_s13, 4  ;;  %s359_s16 = int_to_ptr.vmem [resolvable:$false] %s358_s16 }
  0x3d   : > { %s360_s17 = scalar_lea.vmem %s359_s16, 256  ;;  %p361_p7 = scmp.lt.s32.totalorder %s562_s4, %s359_s16 }
  0x3e   : > { %p357_p13 = pneg %p356_p12  ;;  %p362_p10 = scmp.lt.s32.totalorder %s360_s17, %s354_s14 }
  0x40   : > { %p363_p2 = por %p362_p10, %p361_p7 }
  0x42   : > { %p364_p4 = pnand %p363_p2, %p357_p13 }
  0xc8   : > { %v165_v3 = vpop.xlane.xlu0 %164 }
  0xc9   : > { %v167_v4 = vmul.f32 0.03125, %v165_v3 }
  0xcb   : > { %v168_v5 = vadd.f32 1e-06, %v167_v4 }
  0xcd   : > { %322 = vrsqrt.f32 %v168_v5 }
  0xd7   : > { %v323_v8 = vpop.eup %322 }
  0xd8   : > { %v177_v9 = vmul.f32 %v323_v8, %v176_v7 }
  0xda   : > { %178 = vst.msk [vmem:[%s158_s3] sm:$0xff] %vm162_vm0, %v177_v9 }
  0xdb   : > { %367 = shalt.err (!%p364_p4)
}
  0xdc   : > { %s368_s19 = scalar_lea.hbm %s560_s7, 128  ;;  %s372_s25 = scalar_lea.hbm %s607_s2, 256 }
  0xdd   : > { %p369_p5 = scmp.ne.s32.totalorder %s560_s7, %s368_s19  ;;  %p373_p0 = scmp.lt.u32.totalorder %s560_s7, %s607_s2 }
  0xde   : > { %p374_p1 = scmp.lt.u32.totalorder %s372_s25, %s368_s19  ;;  %p376_p6 = scmp.lt.u32.totalorder %s368_s19, %s560_s7 }
  0xdf   : > { %p370_p8 = pnand %p369_p5, %p616_p11 }
  0xe0   : > { %p375_p3 = por %p374_p1, %p373_p0 }
  0xe1   : > { %p371_p9 = pneg %p370_p8 }
  0xe2   : > { %p377_p12 = por %p376_p6, %p375_p3 }
  0xe4   : > { %p378_p13 = pnand %p377_p12, %p371_p9 }
  0xe6   : > { %381 = shalt.err (!%p378_p13)
}
  0xe7   : > { %278 = dma.vmem_to_hbm [thread:$0]  (%p616_p11), %s562_s4, 128, %s560_s7, %s180_s8  }
  0xe8 PF: > { %s205_s29 = sand.u32 1, %s408_s9   ;;  %p617_p7 = scmp.ne.s32.totalorder %s612_s22, 0 }
  0xe9   : > { %p618_p10 = scmp.ge.s32.totalorder %s420_s12, 2  ;;  %s206_s28 = scalar_lea.sflag [#allocation4], %s205_s29 }
  0xeb   : > { %p285_p2 = pnand %p618_p10, %p617_p7 }
  0xed   : > { %403 = dma.done.wait (!%p285_p2), %s206_s28, 128  }
  0xee   : > { %405 = vsyncadd (!%p285_p2), %s206_s28, 4294967168  ;;  %p15_p4 = scmp.ge.s32.totalorder %s464_s15, 4   ;;  %s619_s9 = smov %s412_s10 }
  0xef   : > { %s620_s10 = smov %s416_s11  ;;  %s621_s11 = smov %s476_s18 }
  0xf0   : > { %s622_s12 = smov %s464_s15  ;;  %17 = sbr.rel (!%p15_p4) target bundleno = 5 (0x5), region = 73 }
  0xf7   :  { %211 = vsyncpa [#allocation3], 1 }
  0xf8   :  { %213 = vsyncpa [#allocation3 + $0x1], 1 }
  0xf9   :  { %214 = vsyncpa [#allocation4], 1 }
  0xfa   :  { %216 = vsyncpa [#allocation4 + $0x1], 1 }

</bundles_post_ra>
